<compile_context>
chip_gen: v6e
topology: v6e:2x2x1
jax: 0.10.0
libtpu: 0.0.40
codegen_flags: <defaults>
</compile_context>

<pallas_src>
import jax
import jax.numpy as jnp
from jax.experimental import pallas as pl
from jax.experimental.pallas import tpu as pltpu


_VMEM_TILE_BUDGET = 24 * 1024 * 1024   # conservative tile budget: fits v5e/v6e/v7x
_VMEM_LIMIT_BYTES = 48 * 1024 * 1024   # scoped VMEM limit handed to Mosaic
_W_RESIDENT_BYTES = 8 * 1024 * 1024    # keep W as a single resident block below this


def _round_up(x, m):
    return ((x + m - 1) // m) * m


def _pick_divisor_tile(dim, pref=512):
    """Largest MXU-friendly tile <= pref that divides dim, else the full dim."""
    for t in (pref, 512, 256, 128):
        if dim >= t and dim % t == 0:
            return t
    return dim


def _matmul_kernel(x_ref, wt_ref, o_ref, acc_ref):
    # Standard accumulate-over-K pattern (K axis is the last, "arbitrary", grid axis).
    @pl.when(pl.program_id(2) == 0)
    def _():
        acc_ref[...] = jnp.zeros_like(acc_ref)

    acc_ref[...] += jnp.dot(
        x_ref[...], wt_ref[...], preferred_element_type=jnp.float32
    )

    @pl.when(pl.program_id(2) == pl.num_programs(2) - 1)
    def _():
        o_ref[...] = acc_ref[...].astype(o_ref.dtype)


def _w_block_spec(tk, tn, index_map, single_buffer):
    if single_buffer:
        try:
            # Constant index_map: one DMA of W, one buffer (no pointless double-buffer).
            return pl.BlockSpec((tk, tn), index_map, pipeline_mode=pl.Buffered(1))
        except TypeError:
            pass  # older Pallas without pipeline_mode kwarg -> fall back to default
    return pl.BlockSpec((tk, tn), index_map)


def dynamics_forward(x, weight, *, compute_dtype=None, force_pallas=False):
    """y = x @ weight.T  (forward of the `dynamics` module).

    compute_dtype: optional MXU input dtype (e.g. jnp.bfloat16); accumulation stays
    f32 and the output keeps x.dtype.  Default None preserves exact f32 semantics.
    """
    b = weight.shape[0]
    assert weight.shape == (b, b)
    assert x.shape[-1] == b
    orig_shape = x.shape
    out_dtype = x.dtype
    x2 = x.reshape(-1, b)
    n = x2.shape[0]

    # Tiny shapes: MXU/vregs never fill and per-step/launch overhead dominates ->
    # plain XLA is faster.  force_pallas overrides (used by the demo/tests).
    if not force_pallas and (b < 128 or n < 8 or n * b * b < (1 << 22)):
        return (x2 @ weight.T).reshape(orig_shape).astype(out_dtype)

    # Pre-transpose W once (outside the kernel) so the kernel never re-layouts it.
    wt = weight.T
    if compute_dtype is not None:
        x2 = x2.astype(compute_dtype)
        wt = wt.astype(compute_dtype)
    itemsize = jnp.dtype(x2.dtype).itemsize
    out_itemsize = jnp.dtype(out_dtype).itemsize

    # ---- tile selection (VMEM-budgeted) ------------------------------------
    if b * b * itemsize <= _W_RESIDENT_BYTES:
        tn = tk = b                      # W resident as one block
    else:
        tn = _pick_divisor_tile(b)       # stream W tiles (needed on v7x for big b)
        tk = _pick_divisor_tile(b)
    w_single_buffer = (tn == b and tk == b)
    w_bufs = 1 if w_single_buffer else 2

    fixed = w_bufs * tk * tn * itemsize
    per_row = 2 * tk * itemsize + 2 * tn * out_itemsize + tn * 4  # x, out (dbl-buf), acc
    tm = max(8, min((_VMEM_TILE_BUDGET - fixed) // per_row, 1024))
    if tm >= 256:
        tm = (tm // 256) * 256           # 256-aligned for v6e/v7x 2x256x256 MXUs
    else:
        tm = (tm // 8) * 8
    tm = max(8, min(tm, _round_up(n, 8)))

    grid = (pl.cdiv(n, tm), b // tn, b // tk)

    cost = pl.CostEstimate(
        flops=2 * n * b * b,
        transcendentals=0,
        bytes_accessed=(n * b + b * b) * itemsize + n * b * out_itemsize,
    )

    # TODO(synk): for iterated dynamics (x_{t+1} = x_t @ W.T over T steps), keep W in a
    # VMEM scratch and fori_loop the steps inside one pallas_call to amortize HBM/launch.
    out = pl.pallas_call(
        _matmul_kernel,
        out_shape=jax.ShapeDtypeStruct((n, b), out_dtype),
        grid_spec=pltpu.PrefetchScalarGridSpec(
            num_scalar_prefetch=0,
            grid=grid,
            in_specs=[
                pl.BlockSpec((tm, tk), lambda i, j, k: (i, k)),
                _w_block_spec(tk, tn, lambda i, j, k: (k, j), w_single_buffer),
            ],
            out_specs=pl.BlockSpec((tm, tn), lambda i, j, k: (i, j)),
            scratch_shapes=[pltpu.VMEM((tm, tn), jnp.float32)],
        ),
        compiler_params=pltpu.CompilerParams(
            dimension_semantics=("parallel", "parallel", "arbitrary"),
            vmem_limit_bytes=_VMEM_LIMIT_BYTES,
        ),
        cost_estimate=cost,
    )(x2, wt)
    return out.reshape(orig_shape)


def init_dynamics_weight(key, b, init_scale):
    """Replicates the PyTorch __init__: Omega ~ N(0, 1/b) elementwise, then the
    orthogonal polar factor via SVD: W = U @ V.T * init_scale."""
    omega = jax.random.normal(key, (b, b), dtype=jnp.float32) * (1.0 / b)
    u, _, vh = jnp.linalg.svd(omega, full_matrices=False)
    return ((u @ vh) * init_scale).astype(jnp.float32)


if __name__ == "__main__":
    key = jax.random.PRNGKey(0)
    k_w, k_x, k_w2, k_x2 = jax.random.split(key, 4)

    # --- primary small demo (module-consistent shapes) ----------------------
    b = 32
    batch = 8
    init_scale = 1.0
    weight = init_dynamics_weight(k_w, b, init_scale)
    x = jax.random.normal(k_x, (batch, b), dtype=jnp.float32)

    y = dynamics_forward(x, weight, force_pallas=True)   # exercise the Pallas kernel
    jax.block_until_ready(y)
    y_ref = x @ weight.T
    assert y.shape == (batch, b)
    assert jnp.allclose(y, y_ref, atol=1e-4, rtol=1e-4)

    # XLA bypass path (tiny-shape default) must match too.
    y_bypass = dynamics_forward(x, weight)
    assert jnp.allclose(y_bypass, y_ref, atol=1e-5, rtol=1e-5)

    # --- second small check: wider hidden dim, non-trivial row count --------
    b2, batch2 = 128, 64
    weight2 = init_dynamics_weight(k_w2, b2, 0.99)
    x2 = jax.random.normal(k_x2, (batch2, b2), dtype=jnp.float32)
    y2 = dynamics_forward(x2, weight2, force_pallas=True)
    jax.block_until_ready(y2)
    assert jnp.allclose(y2, x2 @ weight2.T, atol=1e-4, rtol=1e-4)

    print("KERNEL_OK")
</pallas_src>

<mosaic_0001>
module attributes {stable_mosaic.version = 11 : i64} {
  func.func @_matmul_kernel(%arg0: i32, %arg1: i32, %arg2: i32, %arg3: memref<8x32xf32, #tpu.memory_space<vmem>>, %arg4: memref<32x32xf32, #tpu.memory_space<vmem>>, %arg5: memref<8x32xf32, #tpu.memory_space<vmem>>, %arg6: memref<8x32xf32, #tpu.memory_space<vmem>>) attributes {dimension_semantics = [#tpu.dimension_semantics<parallel>, #tpu.dimension_semantics<parallel>, #tpu.dimension_semantics<arbitrary>], iteration_bounds = array<i64: 1, 1, 1>, scalar_prefetch = 0 : i64, scratch_operands = 1 : i64, tpu.core_type = #tpu.core_type<tc>, window_params = [{transform_indices = @transform_0, window_bounds = array<i64: 8, 32>}, {pipeline_mode = #tpu.pipeline_mode<synchronous>, transform_indices = @transform_1, window_bounds = array<i64: 32, 32>}, {transform_indices = @transform_2, window_bounds = array<i64: 8, 32>}]} {
    %c0_i32 = arith.constant 0 : i32
    %0 = arith.cmpi eq, %arg2, %c0_i32 : i32
    %1 = arith.extui %0 : i1 to i32
    %c0_i32_0 = arith.constant 0 : i32
    %2 = arith.cmpi ne, %1, %c0_i32_0 : i32
    scf.if %2 {
      %cst_10 = arith.constant 0.000000e+00 : f32
      %12 = vector.broadcast %cst_10 : f32 to vector<8x32xf32>
      %c0_11 = arith.constant 0 : index
      %c0_12 = arith.constant 0 : index
      %13 = vector.load %arg6[%c0_11, %c0_12] : memref<8x32xf32, #tpu.memory_space<vmem>>, vector<8x32xf32>
      tpu.vector_store %arg6[%c0_11, %c0_12], %12 {strides = array<i32>} : memref<8x32xf32, #tpu.memory_space<vmem>>, vector<8x32xf32>,
    } else {
    }
    %c0 = arith.constant 0 : index
    %c0_1 = arith.constant 0 : index
    %3 = vector.load %arg6[%c0, %c0_1] : memref<8x32xf32, #tpu.memory_space<vmem>>, vector<8x32xf32>
    %c0_2 = arith.constant 0 : index
    %c0_3 = arith.constant 0 : index
    %4 = vector.load %arg3[%c0_2, %c0_3] : memref<8x32xf32, #tpu.memory_space<vmem>>, vector<8x32xf32>
    %c0_4 = arith.constant 0 : index
    %c0_5 = arith.constant 0 : index
    %5 = vector.load %arg4[%c0_4, %c0_5] : memref<32x32xf32, #tpu.memory_space<vmem>>, vector<32x32xf32>
    %cst = arith.constant dense<0.000000e+00> : vector<8x32xf32>
    %6 = tpu.matmul %4, %5, %cst {dimension_numbers = #tpu.dot_dimension_numbers<[1], [0], [0], [1], [0, 0, 1, 1], [], []>} : vector<8x32xf32>, vector<32x32xf32>, vector<8x32xf32> -> vector<8x32xf32>
    %7 = arith.addf %3, %6 : vector<8x32xf32>
    %c0_6 = arith.constant 0 : index
    %c0_7 = arith.constant 0 : index
    %8 = vector.load %arg6[%c0_6, %c0_7] : memref<8x32xf32, #tpu.memory_space<vmem>>, vector<8x32xf32>
    tpu.vector_store %arg6[%c0_6, %c0_7], %7 {strides = array<i32>} : memref<8x32xf32, #tpu.memory_space<vmem>>, vector<8x32xf32>,
    %c0_i32_8 = arith.constant 0 : i32
    %9 = arith.cmpi eq, %arg2, %c0_i32_8 : i32
    %10 = arith.extui %9 : i1 to i32
    %c0_i32_9 = arith.constant 0 : i32
    %11 = arith.cmpi ne, %10, %c0_i32_9 : i32
    scf.if %11 {
      %c0_10 = arith.constant 0 : index
      %c0_11 = arith.constant 0 : index
      %12 = vector.load %arg6[%c0_10, %c0_11] : memref<8x32xf32, #tpu.memory_space<vmem>>, vector<8x32xf32>
      %c0_12 = arith.constant 0 : index
      %c0_13 = arith.constant 0 : index
      %13 = vector.load %arg5[%c0_12, %c0_13] : memref<8x32xf32, #tpu.memory_space<vmem>>, vector<8x32xf32>
      tpu.vector_store %arg5[%c0_12, %c0_13], %12 {strides = array<i32>} : memref<8x32xf32, #tpu.memory_space<vmem>>, vector<8x32xf32>,
    } else {
    }
    return
  }
  func.func @transform_0(%arg0: i32, %arg1: i32, %arg2: i32) -> (i32, i32) {
    %c0_i32 = arith.constant 0 : i32
    return %arg0, %arg2 : i32, i32
  }
  func.func @transform_1(%arg0: i32, %arg1: i32, %arg2: i32) -> (i32, i32) {
    %c0_i32 = arith.constant 0 : i32
    return %arg2, %arg1 : i32, i32
  }
  func.func @transform_2(%arg0: i32, %arg1: i32, %arg2: i32) -> (i32, i32) {
    %c0_i32 = arith.constant 0 : i32
    return %arg0, %arg1 : i32, i32
  }
}

</mosaic_0001>

<bundles_post_ra>
// kernel: tpu_custom_call.1
= control target key start
LH: loop header
LB: loop body
LE: loop exit
PB: predicated region body
PF: predicated region fallthrough
CT: control target
= control target key end

     0   :  { %7 = vsyncpa [#allocation4], 0  ;;  %s272_s0 = inlined_call_operand.hbm [shape: f32[8,32], index: 0, kind: input, shape index: {}]   ;;  %s273_s1 = inlined_call_operand.hbm [shape: f32[32,32], index: 1, kind: input, shape index: {}]   ;;  %s274_s2 = inlined_call_operand.hbm [shape: f32[8,32], index: 2, kind: output, shape index: {}]  }
   0x1   :  { %8 = vsyncpa [#allocation7], 0 }
   0x2   :  { %9 = vsyncpa [#allocation5], 0  ;;  %s237_s9 = smov [#allocation3]   ;;  %s238_s11 = smov [#allocation6]  }
   0x3   :  { %s16_s10 = sshll.u32 %s237_s9, 4  ;;  %s25_s12 = sshll.u32 %s238_s11, 4  ;;  %s17_s10 = int_to_ptr.vmem [resolvable:$true] %s16_s10  ;;  %s26_s12 = int_to_ptr.vmem [resolvable:$true] %s25_s12 }
   0x4   :  { %s179_s13 = scalar_lea.vmem %s17_s10, 128  ;;  %p184_p1 = scmp.lt.s32.totalorder %s17_s10, %s17_s10 }
   0x5   :  { %p180_p0 = scmp.ne.s32.totalorder %s17_s10, %s179_s13  ;;  %p185_p2 = scmp.lt.s32.totalorder %s179_s13, %s179_s13 }
   0x7   :  { %p186_p3 = por %p185_p2, %p184_p1 }
   0x9   :  { %p187_p4 = pnand %p186_p3, %p180_p0 }
   0xb   :  { %190 = shalt.err (!%p187_p4)
}
   0xc   :  { %19 = dma.hbm_to_vmem [thread:$0]  %s272_s0, 128, %s17_s10, [#allocation4]  }
   0xd   :  { %s199_s16 = scalar_lea.vmem %s26_s12, 512  ;;  %p204_p6 = scmp.lt.s32.totalorder %s26_s12, %s26_s12 }
   0xe   :  { %p200_p5 = scmp.ne.s32.totalorder %s26_s12, %s199_s16  ;;  %p205_p7 = scmp.lt.s32.totalorder %s199_s16, %s199_s16 }
  0x10   :  { %p206_p8 = por %p205_p7, %p204_p6 }
  0x12   :  { %p207_p9 = pnand %p206_p8, %p200_p5 }
  0x14   :  { %210 = shalt.err (!%p207_p9)
}
  0x15   :  { %s239_s17 = smov 128   ;;  %s240_s18 = smov 8  }
  0x16   :  { %31 = dma.hbm_to_vmem [thread:$0]  %s273_s1, 512, %s26_s12, [#allocation7], %s239_s17, %s239_s17, %s240_s18  }
  0x17   :  { %231 = dma.done.wait [#allocation4], 128  }
  0x18   :  { %232 = vsyncadd [#allocation4], 4294967168 }
  0x19   :  { %233 = dma.done.wait [#allocation7], 512  }
  0x1a   :  { %234 = vsyncadd [#allocation7], 4294966784  ;;  %vm42_vm0 = vcmask 261120   ;;  %v241_v0 = vmov 0.0   ;;  %vm242_vm1 = vmmov 0   ;;  %v49_v1 = vld [vmem:[#allocation6 + $0x18] sm:$0xff] }
  0x1b   :  { %153 = vmatprep.subr.mxu0 %v241_v0  ;;  %161 = vmatprep.mubr.msk.f32.mxu0 %vm242_vm1, %v241_v0  ;;  %43 = vst.msk [vmem:[#allocation2] sm:$0xff] %vm42_vm0, %v241_v0  ;;  %v48_v2 = vld [vmem:[#allocation6 + $0x10] sm:$0xff]  ;;  %v47_v3 = vld [vmem:[#allocation6 + $0x8] sm:$0xff]  ;;  %v46_v4 = vld [vmem:[#allocation6] sm:$0xff]  ;;  %s243_s0 = smov [#allocation8]  }
  0x1c   :  { %154 = vmatpush3.msra.mxu0 %v49_v1  ;;  %v45_v5 = vld [vmem:[#allocation3] sm:$0xff]  ;;  %s137_s1 = sshll.u32 %s243_s0, 4  ;;  %s138_s1 = int_to_ptr.vmem [resolvable:$true] %s137_s1 }
  0x1d   :  { %155 = vmatprep.subr.mxu0 %v241_v0  ;;  %s211_s21 = scalar_lea.vmem %s138_s1, 128  ;;  %p216_p11 = scmp.lt.s32.totalorder %s138_s1, %s138_s1 }
  0x1e   :  { %156 = vmatpush3.msra.mxu0 %v48_v2  ;;  %p212_p10 = scmp.ne.s32.totalorder %s138_s1, %s211_s21  ;;  %p217_p12 = scmp.lt.s32.totalorder %s211_s21, %s211_s21 }
  0x1f   :  { %157 = vmatprep.subr.mxu0 %v241_v0 }
  0x20   :  { %158 = vmatpush3.msra.mxu0 %v47_v3  ;;  %p218_p13 = por %p217_p12, %p216_p11 }
  0x21   :  { %159 = vmatprep.subr.mxu0 %v241_v0 }
  0x22   :  { %160 = vmatpush3.msra.mxu0 %v46_v4  ;;  %v44_v6 = vld [vmem:[#allocation2] sm:$0xff]  ;;  %p219_p0 = pnand %p218_p13, %p212_p10 }
  0x23   :  { %162 = vmatmul.mubr.msk.f32.vlgmr.msra.gmra.mxu0 %vm42_vm0, %v45_v5 }
  0xe3   :  { %v120_v7 = vpop.f32.mrf.mxu0 }
  0xe4   :  { %v124_v8 = vadd.f32 %v120_v7, %v44_v6 }
  0xe5   :  { %v163_v9 = vpop.f32.mrf.mxu0 }
  0xe6   :  { %125 = vst.msk [vmem:[#allocation2] sm:$0xff] %vm42_vm0, %v124_v8 }
  0xed   :  { %v129_v10 = vld [vmem:[#allocation2] sm:$0xff] }
  0xee   :  { %130 = vst.msk [vmem:[#allocation8] sm:$0xff] %vm42_vm0, %v129_v10 }
  0xef   :  { %222 = shalt.err (!%p219_p0)
}
  0xf0   :  { %140 = dma.vmem_to_hbm [thread:$0]  %s138_s1, 128, %s274_s2, [#allocation5]  }
  0xf1   :  { %235 = dma.done.wait [#allocation5], 128  }
  0xf2   :  { %236 = vsyncadd [#allocation5], 4294967168 }
  0xf3   :  { %144 = vsyncpa [#allocation4], 1 }
  0xf4   :  { %145 = vsyncpa [#allocation7], 1 }
  0xf5   :  { %146 = vsyncpa [#allocation5], 1 }

</bundles_post_ra>
